<compile_context>
chip_gen: v7x
topology: tpu7x:2x2x1
jax: 0.10.0
libtpu: 0.0.40
codegen_flags: <defaults>
</compile_context>

<pallas_src>
import functools

import jax
import jax.numpy as jnp
from jax.experimental import pallas as pl
from jax.experimental.pallas import tpu as pltpu

EPS = 1e-5
MOMENTUM = 0.9
_MIB = 1024 * 1024


# --------------------------------------------------------------------------
# Per-generation budgets
# --------------------------------------------------------------------------
def _tpu_generation():
    try:
        kind = jax.devices()[0].device_kind.lower()
    except Exception:
        return None
    for tag in ("v7", "v6", "v5", "v4", "v3", "v2"):
        if tag in kind:
            return tag
    return None


def _budgets():
    """Returns (generation, x-tile target bytes, scoped vmem limit bytes)."""
    gen = _tpu_generation()
    if gen == "v7":                      # 64 MiB physical VMEM
        return gen, 3 * _MIB, 48 * _MIB
    if gen in ("v5", "v6"):              # 128 MiB physical VMEM
        return gen, 6 * _MIB, 96 * _MIB
    return gen, 3 * _MIB, 48 * _MIB      # unknown: conservative


def _largest_divisor_at_most(n, cap):
    cap = max(1, min(n, cap))
    for d in range(cap, 0, -1):
        if n % d == 0:
            return d
    return 1


def _choose_tiles(N, C, HW, itemsize, tile_target):
    """Pick (tile_n, tile_hw): one x tile ~= tile_target bytes, tile_hw is either
    full HW or a multiple of 128 (lane-dim block constraint)."""
    per_sample = C * HW * itemsize
    if per_sample <= tile_target:
        return _largest_divisor_at_most(N, max(1, tile_target // per_sample)), HW
    if HW % 128 != 0:
        # TODO(synk): HW not a multiple of 128 cannot be lane-tiled; tile may
        # exceed the target for very large C*HW (a (C, N*H*W) relayout would fix it).
        return 1, HW
    d = HW // 128
    for m in range(d, 0, -1):
        if d % m == 0 and C * 128 * m * itemsize <= tile_target:
            return 1, 128 * m
    return 1, 128


# --------------------------------------------------------------------------
# Kernels
# --------------------------------------------------------------------------
def _bn_fused_kernel(x_ref, gamma_ref, beta_ref, mm_ref, mv_ref,
                     y_ref, new_mm_ref, new_mv_ref, *, inv_count):
    """Single-pass BN: x resident in VMEM, stats + normalize in one kernel."""
    x = x_ref[...].astype(jnp.float32)                     # (N, C, HW)
    s = jnp.sum(x, axis=0)                                 # (C, HW)  VPU adds
    s2 = jnp.sum(x * x, axis=0)
    mean = jnp.sum(s, axis=-1, keepdims=True) * inv_count  # (C, 1)   one lane fold
    var = jnp.maximum(jnp.sum(s2, axis=-1, keepdims=True) * inv_count
                      - mean * mean, 0.0)
    inv_std = jax.lax.rsqrt(var + EPS)                     # EUP
    scale = gamma_ref[...] * inv_std                       # (C, 1) sublane-major
    bias = beta_ref[...] - mean * scale
    new_mm_ref[...] = MOMENTUM * mm_ref[...] + (1.0 - MOMENTUM) * mean
    new_mv_ref[...] = MOMENTUM * mv_ref[...] + (1.0 - MOMENTUM) * var
    y_ref[...] = (x * scale[None, :, :] + bias[None, :, :]).astype(y_ref.dtype)


def _bn_stats_kernel(x_ref, psum_ref, psumsq_ref, sum_sc, sumsq_sc):
    """Per-N-tile partial sum / sumsq over the HW (reduction) grid axis.
    Accumulates (C, tile_hw) in scratch with VPU adds; lane-folds once at the
    end of each N-tile and writes a (1, C, 1) partial."""
    j = pl.program_id(1)

    @pl.when(j == 0)
    def _init():
        sum_sc[...] = jnp.zeros_like(sum_sc)
        sumsq_sc[...] = jnp.zeros_like(sumsq_sc)

    x = x_ref[...].astype(jnp.float32)                     # (tile_n, C, tile_hw)
    sum_sc[...] += jnp.sum(x, axis=0)                      # no cross-lane work
    sumsq_sc[...] += jnp.sum(x * x, axis=0)

    @pl.when(j == pl.num_programs(1) - 1)
    def _emit():
        psum_ref[...] = jnp.sum(sum_sc[...], axis=-1, keepdims=True)[None]
        psumsq_ref[...] = jnp.sum(sumsq_sc[...], axis=-1, keepdims=True)[None]


def _bn_apply_kernel(x_ref, scale_ref, bias_ref, y_ref, *, compute_dtype):
    """y = x * scale[c] + bias[c]; scale/bias are sublane-major (C, 1)."""
    x = x_ref[...].astype(compute_dtype)                   # (tile_n, C, tile_hw)
    scale = scale_ref[...][None, :, :]                     # (1, C, 1) free broadcast
    bias = bias_ref[...][None, :, :]
    y_ref[...] = (x * scale + bias).astype(y_ref.dtype)


# --------------------------------------------------------------------------
# Wrapper
# --------------------------------------------------------------------------
@functools.partial(jax.jit,
                   static_argnames=("training", "tile_n", "tile_hw", "force_two_pass"))
def batch_norm_pallas(x, gamma, beta, moving_mean, moving_var, *,
                      training=True, tile_n=None, tile_hw=None, force_two_pass=False):
    """x: (N, C, H, W) or (N, C); gamma/beta/moving_* shaped like the PyTorch module.
    Returns (Y, new_moving_mean, new_moving_var)."""
    orig_shape = x.shape
    if x.ndim == 2:
        # TODO(synk): a dedicated lane-major layout would be faster for the FC case;
        # folding to (N, C, 1) keeps correctness with the same kernels.
        N, C = x.shape
        HW = 1
    else:
        N, C, H, W = x.shape
        HW = H * W
    count = N * HW
    inv_count = 1.0 / count

    x3 = x.reshape(N, C, HW)            # free relayout: NCHW order kept, H*W on lanes
    g = gamma.reshape(C, 1).astype(jnp.float32)     # sublane-major channel vectors
    b = beta.reshape(C, 1).astype(jnp.float32)
    mm = moving_mean.reshape(C, 1).astype(jnp.float32)
    mv = moving_var.reshape(C, 1).astype(jnp.float32)

    gen, tile_target, vmem_limit = _budgets()
    itemsize = x3.dtype.itemsize
    elems = N * C * HW
    x_bytes = elems * itemsize
    f32_bytes = elems * 4
    stat_shape = moving_mean.shape

    bf16_native = gen in ("v6", "v7")
    compute_dtype = (jnp.bfloat16 if (x3.dtype == jnp.bfloat16 and bf16_native)
                     else jnp.float32)

    # ---------------- fused single-pass path (x resident in VMEM) ----------------
    fused_footprint = 2 * x_bytes + 2 * f32_bytes + 1 * _MIB  # x, y, f32 temps, slack
    if training and not force_two_pass and fused_footprint <= int(0.85 * vmem_limit):
        y3, new_mm, new_mv = pl.pallas_call(
            functools.partial(_bn_fused_kernel, inv_count=inv_count),
            out_shape=(jax.ShapeDtypeStruct((N, C, HW), x3.dtype),
                       jax.ShapeDtypeStruct((C, 1), jnp.float32),
                       jax.ShapeDtypeStruct((C, 1), jnp.float32)),
            compiler_params=pltpu.CompilerParams(vmem_limit_bytes=vmem_limit),
            cost_estimate=pl.CostEstimate(flops=7 * elems, transcendentals=C,
                                          bytes_accessed=2 * x_bytes),
        )(x3, g, b, mm, mv)
        return (y3.reshape(orig_shape),
                new_mm.reshape(stat_shape).astype(moving_mean.dtype),
                new_mv.reshape(stat_shape).astype(moving_var.dtype))

    # ---------------- two-pass tiled path ----------------
    if tile_n is None or tile_hw is None:
        auto_n, auto_hw = _choose_tiles(N, C, HW, itemsize, tile_target)
        if tile_n is None:
            tile_n = auto_n
        if tile_hw is None:
            tile_hw = auto_hw
    assert N % tile_n == 0 and HW % tile_hw == 0, "tiles must divide N / H*W"
    k_n = N // tile_n
    k_hw = HW // tile_hw

    x_spec = pl.BlockSpec((tile_n, C, tile_hw), lambda i, j: (i, 0, j))
    vec_spec = pl.BlockSpec((C, 1), lambda i, j: (0, 0))
    part_spec = pl.BlockSpec((1, C, 1), lambda i, j: (i, 0, 0))

    if training:
        psum, psumsq = pl.pallas_call(
            _bn_stats_kernel,
            out_shape=(jax.ShapeDtypeStruct((k_n, C, 1), jnp.float32),
                       jax.ShapeDtypeStruct((k_n, C, 1), jnp.float32)),
            grid=(k_n, k_hw),
            in_specs=[x_spec],
            out_specs=(part_spec, part_spec),
            scratch_shapes=[pltpu.VMEM((C, tile_hw), jnp.float32),
                            pltpu.VMEM((C, tile_hw), jnp.float32)],
            compiler_params=pltpu.CompilerParams(
                dimension_semantics=("parallel", "arbitrary"),
                vmem_limit_bytes=vmem_limit),
            cost_estimate=pl.CostEstimate(flops=3 * elems, transcendentals=0,
                                          bytes_accessed=x_bytes + 8 * k_n * C),
        )(x3)
        # Tiny (k_n, C) combine + finalize in the wrapper (also what lets the
        # "parallel" N axis shard the stats pass across v7x's two TensorCores).
        total = jnp.sum(psum, axis=0)                      # (C, 1)
        total2 = jnp.sum(psumsq, axis=0)
        mean = total * inv_count
        var = jnp.maximum(total2 * inv_count - mean * mean, 0.0)
        inv_std = jax.lax.rsqrt(var + EPS)
        scale = g * inv_std
        bias = b - mean * scale
        new_mm = MOMENTUM * mm + (1.0 - MOMENTUM) * mean
        new_mv = MOMENTUM * mv + (1.0 - MOMENTUM) * var
    else:
        inv_std = jax.lax.rsqrt(mv + EPS)
        scale = g * inv_std
        bias = b - mm * scale
        new_mm, new_mv = mm, mv

    y3 = pl.pallas_call(
        functools.partial(_bn_apply_kernel, compute_dtype=compute_dtype),
        out_shape=jax.ShapeDtypeStruct((N, C, HW), x3.dtype),
        grid=(k_n, k_hw),
        in_specs=[x_spec, vec_spec, vec_spec],
        out_specs=x_spec,
        compiler_params=pltpu.CompilerParams(
            dimension_semantics=("parallel", "parallel"),
            vmem_limit_bytes=vmem_limit),
        cost_estimate=pl.CostEstimate(flops=2 * elems, transcendentals=0,
                                      bytes_accessed=2 * x_bytes),
    )(x3, scale.astype(compute_dtype), bias.astype(compute_dtype))

    return (y3.reshape(orig_shape),
            new_mm.reshape(stat_shape).astype(moving_mean.dtype),
            new_mv.reshape(stat_shape).astype(moving_var.dtype))


# --------------------------------------------------------------------------
# Reference + tests
# --------------------------------------------------------------------------
def _reference_train(x, gamma, beta, mm, mv, eps=EPS, momentum=MOMENTUM):
    mean = x.mean(axis=(0, 2, 3), keepdims=True)
    var = ((x - mean) ** 2).mean(axis=(0, 2, 3), keepdims=True)
    y = gamma * (x - mean) / jnp.sqrt(var + eps) + beta
    return y, momentum * mm + (1 - momentum) * mean, momentum * mv + (1 - momentum) * var


if __name__ == "__main__":
    key = jax.random.PRNGKey(0)
    k_x, k_g, k_b, k_m, k_v = jax.random.split(key, 5)

    N, C, H, W = 2, 4, 16, 16                               # NCHW like PyTorch
    x = jax.random.normal(k_x, (N, C, H, W), dtype=jnp.float32)
    gamma = 1.0 + 0.1 * jax.random.normal(k_g, (1, C, 1, 1), dtype=jnp.float32)
    beta = 0.1 * jax.random.normal(k_b, (1, C, 1, 1), dtype=jnp.float32)
    moving_mean = 0.1 * jax.random.normal(k_m, (1, C, 1, 1), dtype=jnp.float32)
    moving_var = 1.0 + 0.1 * jnp.abs(jax.random.normal(k_v, (1, C, 1, 1), dtype=jnp.float32))

    y_ref, mm_ref, mv_ref = _reference_train(x, gamma, beta, moving_mean, moving_var)

    # 1) fused single-pass path (x resident in VMEM) — default for small shapes
    y, nmm, nmv = batch_norm_pallas(x, gamma, beta, moving_mean, moving_var)
    jax.block_until_ready((y, nmm, nmv))
    assert jnp.allclose(y, y_ref, atol=1e-4, rtol=1e-4)
    assert jnp.allclose(nmm, mm_ref, atol=1e-5)
    assert jnp.allclose(nmv, mv_ref, atol=1e-5)

    # 2) two-pass tiled path: forces a (2, 2) grid over N and HW tiles
    y2, nmm2, nmv2 = batch_norm_pallas(x, gamma, beta, moving_mean, moving_var,
                                       force_two_pass=True, tile_n=1, tile_hw=128)
    jax.block_until_ready((y2, nmm2, nmv2))
    assert jnp.allclose(y2, y_ref, atol=1e-4, rtol=1e-4)
    assert jnp.allclose(nmm2, mm_ref, atol=1e-5)
    assert jnp.allclose(nmv2, mv_ref, atol=1e-5)

    # 3) inference path (normalize with moving stats)
    y_inf, imm, imv = batch_norm_pallas(x, gamma, beta, moving_mean, moving_var,
                                        training=False)
    jax.block_until_ready(y_inf)
    y_inf_ref = gamma * (x - moving_mean) / jnp.sqrt(moving_var + EPS) + beta
    assert jnp.allclose(y_inf, y_inf_ref, atol=1e-4, rtol=1e-4)
    assert jnp.allclose(imm, moving_mean, atol=1e-6)
    assert jnp.allclose(imv, moving_var, atol=1e-6)

    # 4) bf16 I/O (f32 accumulation; bf16 apply math on v6e/v7x)
    x_bf = x.astype(jnp.bfloat16)
    yb_ref, mmb_ref, mvb_ref = _reference_train(x_bf.astype(jnp.float32), gamma, beta,
                                                moving_mean, moving_var)
    for kwargs in ({}, dict(force_two_pass=True, tile_n=1, tile_hw=128)):
        yb, mmb, mvb = batch_norm_pallas(x_bf, gamma, beta, moving_mean, moving_var,
                                         **kwargs)
        jax.block_until_ready((yb, mmb, mvb))
        assert yb.dtype == jnp.bfloat16
        assert jnp.allclose(yb.astype(jnp.float32), yb_ref, atol=0.1, rtol=0.1)
        assert jnp.allclose(mmb, mmb_ref, atol=1e-5)
        assert jnp.allclose(mvb, mvb_ref, atol=1e-5)

    # 5) 2-D (fully-connected) case from the reference module
    x2 = jax.random.normal(k_x, (8, 32), dtype=jnp.float32)
    g2 = jnp.ones((1, 32), jnp.float32)
    b2 = jnp.zeros((1, 32), jnp.float32)
    m2 = jnp.zeros((1, 32), jnp.float32)
    v2 = jnp.ones((1, 32), jnp.float32)
    y2d, mm2d, mv2d = batch_norm_pallas(x2, g2, b2, m2, v2)
    jax.block_until_ready((y2d, mm2d, mv2d))
    mean2 = x2.mean(axis=0)
    var2 = ((x2 - mean2) ** 2).mean(axis=0)
    y2d_ref = g2 * (x2 - mean2) / jnp.sqrt(var2 + EPS) + b2
    assert jnp.allclose(y2d, y2d_ref, atol=1e-4, rtol=1e-4)
    assert jnp.allclose(mm2d, MOMENTUM * m2 + (1 - MOMENTUM) * mean2, atol=1e-5)
    assert jnp.allclose(mv2d, MOMENTUM * v2 + (1 - MOMENTUM) * var2, atol=1e-5)

    print("KERNEL_OK")
</pallas_src>

<mosaic_0001>
module attributes {stable_mosaic.version = 11 : i64} {
  func.func @_bn_fused_kernel(%arg0: memref<2x4x256xf32, #tpu.memory_space<vmem>>, %arg1: memref<4x1xf32, #tpu.memory_space<vmem>>, %arg2: memref<4x1xf32, #tpu.memory_space<vmem>>, %arg3: memref<4x1xf32, #tpu.memory_space<vmem>>, %arg4: memref<4x1xf32, #tpu.memory_space<vmem>>, %arg5: memref<2x4x256xf32, #tpu.memory_space<vmem>>, %arg6: memref<4x1xf32, #tpu.memory_space<vmem>>, %arg7: memref<4x1xf32, #tpu.memory_space<vmem>>) attributes {dimension_semantics = [], scalar_prefetch = 0 : i64, scratch_operands = 0 : i64, tpu.core_type = #tpu.core_type<tc>} {
    %c0 = arith.constant 0 : index
    %c0_0 = arith.constant 0 : index
    %c0_1 = arith.constant 0 : index
    %0 = vector.load %arg0[%c0, %c0_0, %c0_1] : memref<2x4x256xf32, #tpu.memory_space<vmem>>, vector<2x4x256xf32>
    %cst = arith.constant dense<0.000000e+00> : vector<4x256xf32>
    %1 = vector.multi_reduction <add>, %0, %cst [0] : vector<2x4x256xf32> to vector<4x256xf32>
    %2 = arith.mulf %0, %0 : vector<2x4x256xf32>
    %cst_2 = arith.constant dense<0.000000e+00> : vector<4x256xf32>
    %3 = vector.multi_reduction <add>, %2, %cst_2 [0] : vector<2x4x256xf32> to vector<4x256xf32>
    %cst_3 = arith.constant dense<0.000000e+00> : vector<4xf32>
    %4 = vector.multi_reduction <add>, %1, %cst_3 [1] : vector<4x256xf32> to vector<4xf32>
    %5 = vector.shape_cast %4 : vector<4xf32> to vector<4x1xf32>
    %cst_4 = arith.constant 0.001953125 : f32
    %6 = vector.broadcast %cst_4 : f32 to vector<4x1xf32>
    %7 = arith.mulf %5, %6 : vector<4x1xf32>
    %cst_5 = arith.constant dense<0.000000e+00> : vector<4xf32>
    %8 = vector.multi_reduction <add>, %3, %cst_5 [1] : vector<4x256xf32> to vector<4xf32>
    %9 = vector.shape_cast %8 : vector<4xf32> to vector<4x1xf32>
    %cst_6 = arith.constant 0.001953125 : f32
    %10 = vector.broadcast %cst_6 : f32 to vector<4x1xf32>
    %11 = arith.mulf %9, %10 : vector<4x1xf32>
    %12 = arith.mulf %7, %7 : vector<4x1xf32>
    %13 = arith.subf %11, %12 : vector<4x1xf32>
    %cst_7 = arith.constant 0.000000e+00 : f32
    %14 = vector.broadcast %cst_7 : f32 to vector<4x1xf32>
    %15 = arith.maximumf %13, %14 : vector<4x1xf32>
    %cst_8 = arith.constant 9.99999974E-6 : f32
    %16 = vector.broadcast %cst_8 : f32 to vector<4x1xf32>
    %17 = arith.addf %15, %16 : vector<4x1xf32>
    %18 = math.rsqrt %17 : vector<4x1xf32>
    %c0_9 = arith.constant 0 : index
    %c0_10 = arith.constant 0 : index
    %19 = vector.load %arg1[%c0_9, %c0_10] : memref<4x1xf32, #tpu.memory_space<vmem>>, vector<4x1xf32>
    %20 = arith.mulf %19, %18 : vector<4x1xf32>
    %c0_11 = arith.constant 0 : index
    %c0_12 = arith.constant 0 : index
    %21 = vector.load %arg2[%c0_11, %c0_12] : memref<4x1xf32, #tpu.memory_space<vmem>>, vector<4x1xf32>
    %22 = arith.mulf %7, %20 : vector<4x1xf32>
    %23 = arith.subf %21, %22 : vector<4x1xf32>
    %c0_13 = arith.constant 0 : index
    %c0_14 = arith.constant 0 : index
    %24 = vector.load %arg3[%c0_13, %c0_14] : memref<4x1xf32, #tpu.memory_space<vmem>>, vector<4x1xf32>
    %cst_15 = arith.constant 0.899999976 : f32
    %25 = vector.broadcast %cst_15 : f32 to vector<4x1xf32>
    %26 = arith.mulf %25, %24 : vector<4x1xf32>
    %cst_16 = arith.constant 1.000000e-01 : f32
    %27 = vector.broadcast %cst_16 : f32 to vector<4x1xf32>
    %28 = arith.mulf %27, %7 : vector<4x1xf32>
    %29 = arith.addf %26, %28 : vector<4x1xf32>
    %c0_17 = arith.constant 0 : index
    %c0_18 = arith.constant 0 : index
    %30 = vector.load %arg6[%c0_17, %c0_18] : memref<4x1xf32, #tpu.memory_space<vmem>>, vector<4x1xf32>
    tpu.vector_store %arg6[%c0_17, %c0_18], %29 {strides = array<i32>} : memref<4x1xf32, #tpu.memory_space<vmem>>, vector<4x1xf32>,
    %c0_19 = arith.constant 0 : index
    %c0_20 = arith.constant 0 : index
    %31 = vector.load %arg4[%c0_19, %c0_20] : memref<4x1xf32, #tpu.memory_space<vmem>>, vector<4x1xf32>
    %cst_21 = arith.constant 0.899999976 : f32
    %32 = vector.broadcast %cst_21 : f32 to vector<4x1xf32>
    %33 = arith.mulf %32, %31 : vector<4x1xf32>
    %cst_22 = arith.constant 1.000000e-01 : f32
    %34 = vector.broadcast %cst_22 : f32 to vector<4x1xf32>
    %35 = arith.mulf %34, %15 : vector<4x1xf32>
    %36 = arith.addf %33, %35 : vector<4x1xf32>
    %c0_23 = arith.constant 0 : index
    %c0_24 = arith.constant 0 : index
    %37 = vector.load %arg7[%c0_23, %c0_24] : memref<4x1xf32, #tpu.memory_space<vmem>>, vector<4x1xf32>
    tpu.vector_store %arg7[%c0_23, %c0_24], %36 {strides = array<i32>} : memref<4x1xf32, #tpu.memory_space<vmem>>, vector<4x1xf32>,
    %38 = vector.shape_cast %20 : vector<4x1xf32> to vector<1x4x1xf32>
    %39 = vector.broadcast %38 : vector<1x4x1xf32> to vector<2x4x256xf32>
    %40 = arith.mulf %0, %39 : vector<2x4x256xf32>
    %41 = vector.shape_cast %23 : vector<4x1xf32> to vector<1x4x1xf32>
    %42 = vector.broadcast %41 : vector<1x4x1xf32> to vector<2x4x256xf32>
    %43 = arith.addf %40, %42 : vector<2x4x256xf32>
    %c0_25 = arith.constant 0 : index
    %c0_26 = arith.constant 0 : index
    %c0_27 = arith.constant 0 : index
    %44 = vector.load %arg5[%c0_25, %c0_26, %c0_27] : memref<2x4x256xf32, #tpu.memory_space<vmem>>, vector<2x4x256xf32>
    tpu.vector_store %arg5[%c0_25, %c0_26, %c0_27], %43 {strides = array<i32>} : memref<2x4x256xf32, #tpu.memory_space<vmem>>, vector<2x4x256xf32>,
    return
  }
}

</mosaic_0001>

<bundles_post_ra>
// kernel: batch_norm_pallas.1
= control target key start
LH: loop header
LB: loop body
LE: loop exit
PB: predicated region body
PF: predicated region fallthrough
CT: control target
= control target key end

     0   :  { %vm31_vm0 = vcmask 1043456   ;;  %v135_v26 = vmov 0   ;;  %vm78_vm1 = vcmask 3072   ;;  %v136_v49 = vmov 839922192   ;;  %s235_s0 = inlined_call_operand.vmem [shape: f32[2,4,256], index: 0, kind: input, shape index: {}]   ;;  %s236_s3 = inlined_call_operand.vmem [shape: f32[4,1], index: 3, kind: input, shape index: {}]   ;;  %s237_s4 = inlined_call_operand.vmem [shape: f32[4,1], index: 4, kind: input, shape index: {}]   ;;  %s238_s6 = inlined_call_operand.vmem [shape: f32[4,1], index: 6, kind: output, shape index: {1}]   ;;  %s239_s7 = inlined_call_operand.vmem [shape: f32[4,1], index: 7, kind: output, shape index: {2}]   ;;  %s240_s1 = inlined_call_operand.vmem [shape: f32[4,1], index: 1, kind: input, shape index: {}]   ;;  %s241_s2 = inlined_call_operand.vmem [shape: f32[4,1], index: 2, kind: input, shape index: {}]   ;;  %s242_s5 = inlined_call_operand.vmem [shape: f32[2,4,256], index: 5, kind: output, shape index: {0}]  }
   0x1   :  { %v180_v0 = vld [vmem:[%s235_s0] sm:$0xff]  ;;  %v185_v1 = vld [vmem:[%s235_s0 + $0x8] sm:$0xff]  ;;  %129 = vset.pattern.permute.xlu1 %v135_v26  ;;  %130 = vset.pattern.permute.xlu0 %v135_v26  ;;  %v90_v50 = vunpack.c.l.s4 %v136_v49  ;;  %v92_v51 = vlaneseq }
   0x2   :  { %v27_v2 = vcombine.high %v180_v0, %v180_v0  ;;  %v28_v3 = vcombine.high %v185_v1, %v185_v1  ;;  %v32_v4 = vsel %vm31_vm0, %v180_v0, 0.0  ;;  %v33_v5 = vsel %vm31_vm0, %v185_v1, 0.0  ;;  %v74_v27 = vld [vmem:[%s236_s3] sm:$0xf] }
   0x3   :  { %v34_v6 = vadd.f32 %v33_v5, %v32_v4  ;;  %v38_v7 = vmul.f32 %v180_v0, %v180_v0  ;;  %v39_v8 = vmul.f32 %v185_v1, %v185_v1  ;;  %v75_v29 = vmul.f32 0.9, %v74_v27  ;;  %v80_v36 = vld [vmem:[%s237_s4] sm:$0xf] }
   0x4   :  { %v35_v9 = vsel %vm31_vm0, %v27_v2, 0.0  ;;  %v36_v10 = vsel %vm31_vm0, %v28_v3, 0.0  ;;  %v81_v38 = vmul.f32 0.9, %v80_v36  ;;  %v69_v43 = vld [vmem:[%s240_s1] sm:$0xf]  ;;  %v91_v52 = vunpack.c.0.s8 %v90_v50 }
   0x5   :  { %v37_v11 = vadd.f32 %v36_v10, %v35_v9  ;;  %v52_v12 = vsel %vm31_vm0, %v34_v6, 0.0  ;;  %v42_v13 = vcombine.high %v38_v7, %v38_v7  ;;  %v43_v14 = vcombine.high %v39_v8, %v39_v8  ;;  %v71_v46 = vld [vmem:[%s241_s2] sm:$0xf] }
   0x6   :  { %v46_v15 = vsel %vm31_vm0, %v38_v7, 0.0  ;;  %v47_v16 = vsel %vm31_vm0, %v39_v8, 0.0  ;;  %v93_v53 = vshrl.u32 %v92_v51, 7 }
   0x7   :  { %v53_v17 = vsel %vm31_vm0, %v37_v11, 0.0  ;;  %v48_v18 = vadd.f32 %v47_v16, %v46_v15  ;;  %v49_v19 = vsel %vm31_vm0, %v42_v13, 0.0  ;;  %v50_v20 = vsel %vm31_vm0, %v43_v14, 0.0 }
   0x8   :  { %v54_v21 = vadd.f32 %v53_v17, %v52_v12  ;;  %v51_v22 = vadd.f32 %v50_v20, %v49_v19  ;;  %v94_v54 = vsub.s32 %v91_v52, %v93_v53 }
   0x9   :  { %v58_v23 = vsel %vm31_vm0, %v48_v18, 0.0 }
   0xa   :  { %55 = vadd.xlane.f32.xlu0 %v54_v21  ;;  %v59_v24 = vsel %vm31_vm0, %v51_v22, 0.0 }
   0xb   :  { %v60_v25 = vadd.f32 %v59_v24, %v58_v23 }
   0xe   :  { %61 = vadd.xlane.f32.xlu0 %v60_v25 }
  0x97   :  { %v56_v28 = vpop.xlane.xlu0 %55 }
  0x98   :  { %v57_v30 = vmul.f32 0.001953125, %v56_v28 }
  0x9a   :  { %v76_v31 = vmul.f32 0.1, %v57_v30  ;;  %v64_v34 = vmul.f32 %v57_v30, %v57_v30 }
  0x9b   :  { %v62_v32 = vpop.xlane.xlu0 %61 }
  0x9c   :  { %v77_v33 = vadd.f32 %v76_v31, %v75_v29  ;;  %v63_v35 = vmul.f32 0.001953125, %v62_v32 }
  0x9e   :  { %79 = vst.msk [vmem:[%s238_s6] sm:$0xf] %vm78_vm1, %v77_v33  ;;  %v65_v37 = vsub.f32 %v63_v35, %v64_v34 }
  0xa0   :  { %v66_v39 = vmax.f32 %v65_v37, 0.0 }
  0xa2   :  { %v67_v40 = vadd.f32 1e-05, %v66_v39  ;;  %v82_v41 = vmul.f32 0.1, %v66_v39 }
  0xa4   :  { %133 = vrsqrt.f32 %v67_v40  ;;  %v83_v42 = vadd.f32 %v82_v41, %v81_v38 }
  0xa6   :  { %84 = vst.msk [vmem:[%s239_s7] sm:$0xf] %vm78_vm1, %v83_v42 }
  0xae   :  { %v134_v44 = vpop.eup %133 }
  0xaf   :  { %v70_v45 = vmul.f32 %v134_v44, %v69_v43 }
  0xb1   :  { %87 = vperm.xlu1 %129, %v70_v45   ;;  %v72_v47 = vmul.f32 %v70_v45, %v57_v30 }
  0xb3   :  { %v73_v48 = vsub.f32 %v71_v46, %v72_v47 }
  0xb5   :  { %101 = vperm.xlu1 %129, %v73_v48  }
 0x130   :  { %v88_v55 = vpop.permute.xlu1 %87 }
 0x131   :  { %v95_v56 = vrot.slane %v88_v55, %v94_v54 }
 0x133   :  { %v97_v58 = vmul.f32 %v95_v56, %v180_v0  ;;  %v98_v59 = vmul.f32 %v95_v56, %v185_v1 }
 0x134   :  { %v102_v57 = vpop.permute.xlu1 %101 }
 0x135   :  { %v109_v60 = vrot.slane %v102_v57, %v94_v54 }
 0x137   :  { %v111_v61 = vadd.f32 %v109_v60, %v97_v58  ;;  %v112_v62 = vadd.f32 %v109_v60, %v98_v59 }
 0x139   :  { %113 = vst [vmem:[%s242_s5] sm:$0xff] %v111_v61  ;;  %114 = vst [vmem:[%s242_s5 + $0x8] sm:$0xff] %v112_v62 }

</bundles_post_ra>
